<compile_context>
chip_gen: v6e
topology: v6e:2x2x1
jax: 0.10.0
libtpu: 0.0.40
codegen_flags: <defaults>
</compile_context>

<pallas_src>
import functools

import jax
import jax.numpy as jnp
from jax.experimental import pallas as pl
from jax.experimental.pallas import tpu as pltpu

BN_EPS = 1e-5
_VMEM_BUDGET_BYTES = 12 * 1024 * 1024  # stay under v5e's 16 MiB scoped default


def _fused_kernel(x_ref, w_ref, b_ref, out_ref, *, seg_bounds):
    """Fused multi-path Linear (BN pre-folded into W/b) + per-path Softmax.

    x_ref:   (TN, F)      batch tile of flattened features
    w_ref:   (F, O_pad)   all paths' BN-folded weights, zero-padded lanes
    b_ref:   (1, O_pad)   all paths' BN-folded biases, zero-padded lanes
    out_ref: (TN, O_pad)  hstacked per-path softmax probs (pad lanes = 0)
    """
    logits = jnp.dot(x_ref[...], w_ref[...], preferred_element_type=jnp.float32)
    logits = logits + b_ref[...]                                     # (TN, O_pad)

    # Per-path softmax on static lane slices, then ONE lane-dense store.
    pieces = []
    for s, e in seg_bounds:
        lg = logits[:, s:e]
        m = jnp.max(lg, axis=1, keepdims=True)
        ex = jnp.exp(lg - m)
        denom = jnp.sum(ex, axis=1, keepdims=True)
        pieces.append(ex * pl.reciprocal(denom, approx=True))
    o_total = seg_bounds[-1][1]
    o_pad = out_ref.shape[1]
    if o_pad > o_total:
        pieces.append(jnp.zeros((out_ref.shape[0], o_pad - o_total), jnp.float32))
    out_ref[...] = jnp.concatenate(pieces, axis=1).astype(out_ref.dtype)


def _choose_tile_n(n, f, o_pad):
    """Largest power-of-two batch tile that fits the VMEM budget (capped at n)."""
    n8 = ((n + 7) // 8) * 8

    def vmem_bytes(tn):
        # double-buffered x / out tiles + (conservatively double-buffered) W, b
        return 4 * (2 * tn * f + 2 * tn * o_pad + 2 * f * o_pad + 2 * o_pad)

    tile = 8
    for cand in (512, 256, 128, 64, 32, 16, 8):
        if vmem_bytes(cand) <= _VMEM_BUDGET_BYTES:
            tile = cand
            break
    return min(tile, n8)


def multi_output_forward(features, params):
    """features: (N, C, H, W); params: list of per-path dicts (gamma, beta, w_t, b)."""
    n = features.shape[0]
    x2d = features.reshape(n, -1)                    # nn.Flatten()
    if x2d.dtype != jnp.float32:
        x2d = x2d.astype(jnp.float32)
    f = x2d.shape[1]

    # BatchNorm1d training-mode statistics over the FULL batch, single pass
    # over x (biased variance, matching PyTorch's normalization in training).
    m1 = jnp.mean(x2d, axis=0, keepdims=True)                        # (1, F)
    m2 = jnp.mean(x2d * x2d, axis=0, keepdims=True)                  # (1, F)
    var = jnp.maximum(m2 - m1 * m1, 0.0)
    inv_std = jax.lax.rsqrt(var + BN_EPS)                            # (1, F)

    # Fold BN (normalize + affine) into each path's Linear and concatenate.
    #   logits = x @ (s*W) + ((beta - mean*s) @ W + b),  s = gamma * inv_std
    w_parts, b_parts, sizes = [], [], []
    for p in params:
        s = p["gamma"] * inv_std                                     # (1, F)
        w_parts.append(s.reshape(f, 1) * p["w_t"])                   # (F, O_p)
        b_parts.append((p["beta"] - m1 * s) @ p["w_t"] + p["b"])     # (1, O_p)
        sizes.append(p["w_t"].shape[1])
    o_total = sum(sizes)
    o_pad = pl.cdiv(o_total, 128) * 128                              # lane-dense output
    w_all = jnp.concatenate(w_parts, axis=1)                         # (F, O_total)
    b_all = jnp.concatenate(b_parts, axis=1)                         # (1, O_total)
    if o_pad > o_total:
        w_all = jnp.pad(w_all, ((0, 0), (0, o_pad - o_total)))
        b_all = jnp.pad(b_all, ((0, 0), (0, o_pad - o_total)))

    seg_bounds = []
    off = 0
    for o in sizes:
        seg_bounds.append((off, off + o))
        off += o
    seg_bounds = tuple(seg_bounds)

    # Tile the batch; pad rows up to a tile multiple (pad rows are sliced off).
    tile_n = _choose_tile_n(n, f, o_pad)
    n_k = pl.cdiv(n, tile_n) * tile_n
    x_k = jnp.pad(x2d, ((0, n_k - n), (0, 0))) if n_k > n else x2d
    grid = (n_k // tile_n,)

    out = pl.pallas_call(
        functools.partial(_fused_kernel, seg_bounds=seg_bounds),
        out_shape=jax.ShapeDtypeStruct((n_k, o_pad), jnp.float32),
        grid=grid,
        in_specs=[
            pl.BlockSpec((tile_n, f), lambda i: (i, 0)),   # x tile (pipelined)
            pl.BlockSpec((f, o_pad), lambda i: (0, 0)),    # fused BN-folded weights
            pl.BlockSpec((1, o_pad), lambda i: (0, 0)),    # fused BN-folded bias
        ],
        out_specs=pl.BlockSpec((tile_n, o_pad), lambda i: (i, 0)),
        compiler_params=pltpu.CompilerParams(
            dimension_semantics=("parallel",),             # shard row tiles across TCs
        ),
    )(x_k, w_all, b_all)

    return out[:n, :o_total]                               # drop batch/lane padding


def init_params(key, in_features, out_sizes):
    """Deterministic 'normal'-style init for each path's BN affine + Linear."""
    params = []
    for o in out_sizes:
        key, k1, k2, k3, k4 = jax.random.split(key, 5)
        params.append(
            dict(
                gamma=(1.0 + 0.1 * jax.random.normal(k1, (1, in_features))).astype(jnp.float32),
                beta=(0.1 * jax.random.normal(k2, (1, in_features))).astype(jnp.float32),
                # stored as (F, O) = PyTorch weight (O, F) transposed
                w_t=(0.01 * jax.random.normal(k3, (in_features, o))).astype(jnp.float32),
                b=(0.01 * jax.random.normal(k4, (1, o))).astype(jnp.float32),
            )
        )
    return params


def _reference(features, params):
    """Pure-JAX reference matching PyTorch training-mode forward."""
    n = features.shape[0]
    x2d = features.reshape(n, -1).astype(jnp.float32)
    mean = jnp.mean(x2d, axis=0, keepdims=True)
    var = jnp.mean(jnp.square(x2d - mean), axis=0, keepdims=True)
    x_hat = (x2d - mean) / jnp.sqrt(var + BN_EPS)
    outs = []
    for p in params:
        z = x_hat * p["gamma"] + p["beta"]
        logits = z @ p["w_t"] + p["b"]
        outs.append(jax.nn.softmax(logits, axis=1))
    return jnp.concatenate(outs, axis=1)


# TODO(synk): BatchNorm running-stats update (momentum) is a training-time side
# effect that does not change this forward output; it is not implemented.

if __name__ == "__main__":
    key = jax.random.PRNGKey(0)

    # Small shapes consistent with the module: NCHW input, flattened per path.
    N, C, H, W = 4, 4, 8, 8
    in_features = C * H * W            # 256
    out_sizes = (8, 16)                # two output paths -> hstacked (N, 24)

    kx, kp = jax.random.split(key)
    x = jax.random.normal(kx, (N, C, H, W), dtype=jnp.float32)
    params = init_params(kp, in_features, out_sizes)

    fwd = jax.jit(multi_output_forward)
    out = jax.block_until_ready(fwd(x, params))

    assert out.shape == (N, sum(out_sizes)), out.shape

    # Each path's softmax rows should sum to ~1 (approx reciprocal => looser tol).
    off = 0
    for o in out_sizes:
        s = jnp.sum(out[:, off:off + o], axis=1)
        assert jnp.allclose(s, 1.0, atol=2e-3), s
        off += o

    # Match the pure-JAX / PyTorch-training-mode reference.
    ref = _reference(x, params)
    assert jnp.allclose(out, ref, atol=2e-3, rtol=2e-3), float(jnp.max(jnp.abs(out - ref)))

    print("KERNEL_OK")
</pallas_src>

<mosaic_0001>
module attributes {stable_mosaic.version = 11 : i64} {
  func.func @_fused_kernel(%arg0: i32, %arg1: memref<8x256xf32, #tpu.memory_space<vmem>>, %arg2: memref<256x128xf32, #tpu.memory_space<vmem>>, %arg3: memref<1x128xf32, #tpu.memory_space<vmem>>, %arg4: memref<8x128xf32, #tpu.memory_space<vmem>>) attributes {dimension_semantics = [#tpu.dimension_semantics<parallel>], iteration_bounds = array<i64: 1>, scalar_prefetch = 0 : i64, scratch_operands = 0 : i64, tpu.core_type = #tpu.core_type<tc>, window_params = [{transform_indices = @transform_0, window_bounds = array<i64: 8, 256>}, {pipeline_mode = #tpu.pipeline_mode<synchronous>, transform_indices = @transform_1, window_bounds = array<i64: 256, 128>}, {pipeline_mode = #tpu.pipeline_mode<synchronous>, transform_indices = @transform_2, window_bounds = array<i64: 1, 128>}, {transform_indices = @transform_3, window_bounds = array<i64: 8, 128>}]} {
    %c0 = arith.constant 0 : index
    %c0_0 = arith.constant 0 : index
    %0 = vector.load %arg1[%c0, %c0_0] : memref<8x256xf32, #tpu.memory_space<vmem>>, vector<8x256xf32>
    %c0_1 = arith.constant 0 : index
    %c0_2 = arith.constant 0 : index
    %1 = vector.load %arg2[%c0_1, %c0_2] : memref<256x128xf32, #tpu.memory_space<vmem>>, vector<256x128xf32>
    %cst = arith.constant dense<0.000000e+00> : vector<8x128xf32>
    %2 = tpu.matmul %0, %1, %cst {dimension_numbers = #tpu.dot_dimension_numbers<[1], [0], [0], [1], [0, 0, 1, 1], [], []>} : vector<8x256xf32>, vector<256x128xf32>, vector<8x128xf32> -> vector<8x128xf32>
    %c0_3 = arith.constant 0 : index
    %c0_4 = arith.constant 0 : index
    %3 = vector.load %arg3[%c0_3, %c0_4] : memref<1x128xf32, #tpu.memory_space<vmem>>, vector<1x128xf32>
    %4 = vector.broadcast %3 : vector<1x128xf32> to vector<8x128xf32>
    %5 = arith.addf %2, %4 : vector<8x128xf32>
    %6 = vector.extract_strided_slice %5 {offsets = [0, 0], sizes = [8, 8], strides = [1, 1]} : vector<8x128xf32> to vector<8x8xf32>
    %cst_5 = arith.constant dense<0xFF800000> : vector<8xf32>
    %7 = vector.multi_reduction <maximumf>, %6, %cst_5 [1] : vector<8x8xf32> to vector<8xf32>
    %8 = vector.shape_cast %7 : vector<8xf32> to vector<8x1xf32>
    %9 = vector.broadcast %8 : vector<8x1xf32> to vector<8x8xf32>
    %10 = arith.subf %6, %9 : vector<8x8xf32>
    %11 = math.exp %10 : vector<8x8xf32>
    %cst_6 = arith.constant dense<0.000000e+00> : vector<8xf32>
    %12 = vector.multi_reduction <add>, %11, %cst_6 [1] : vector<8x8xf32> to vector<8xf32>
    %13 = vector.shape_cast %12 : vector<8xf32> to vector<8x1xf32>
    %14 = tpu.reciprocal %13 {approx = true} : vector<8x1xf32> -> vector<8x1xf32>
    %15 = vector.broadcast %14 : vector<8x1xf32> to vector<8x8xf32>
    %16 = arith.mulf %11, %15 : vector<8x8xf32>
    %17 = vector.extract_strided_slice %5 {offsets = [0, 8], sizes = [8, 16], strides = [1, 1]} : vector<8x128xf32> to vector<8x16xf32>
    %cst_7 = arith.constant dense<0xFF800000> : vector<8xf32>
    %18 = vector.multi_reduction <maximumf>, %17, %cst_7 [1] : vector<8x16xf32> to vector<8xf32>
    %19 = vector.shape_cast %18 : vector<8xf32> to vector<8x1xf32>
    %20 = vector.broadcast %19 : vector<8x1xf32> to vector<8x16xf32>
    %21 = arith.subf %17, %20 : vector<8x16xf32>
    %22 = math.exp %21 : vector<8x16xf32>
    %cst_8 = arith.constant dense<0.000000e+00> : vector<8xf32>
    %23 = vector.multi_reduction <add>, %22, %cst_8 [1] : vector<8x16xf32> to vector<8xf32>
    %24 = vector.shape_cast %23 : vector<8xf32> to vector<8x1xf32>
    %25 = tpu.reciprocal %24 {approx = true} : vector<8x1xf32> -> vector<8x1xf32>
    %26 = vector.broadcast %25 : vector<8x1xf32> to vector<8x16xf32>
    %27 = arith.mulf %22, %26 : vector<8x16xf32>
    %cst_9 = arith.constant 0.000000e+00 : f32
    %28 = vector.broadcast %cst_9 : f32 to vector<8x104xf32>
    %29 = tpu.concatenate %16, %27, %28 in 1 : vector<8x8xf32>, vector<8x16xf32>, vector<8x104xf32> -> vector<8x128xf32>
    %c0_10 = arith.constant 0 : index
    %c0_11 = arith.constant 0 : index
    %30 = vector.load %arg4[%c0_10, %c0_11] : memref<8x128xf32, #tpu.memory_space<vmem>>, vector<8x128xf32>
    tpu.vector_store %arg4[%c0_10, %c0_11], %29 {strides = array<i32>} : memref<8x128xf32, #tpu.memory_space<vmem>>, vector<8x128xf32>,
    return
  }
  func.func @transform_0(%arg0: i32) -> (i32, i32) {
    %c0_i32 = arith.constant 0 : i32
    %c0_i32_0 = arith.constant 0 : i32
    return %arg0, %c0_i32 : i32, i32
  }
  func.func @transform_1(%arg0: i32) -> (i32, i32) {
    %c0_i32 = arith.constant 0 : i32
    %c0_i32_0 = arith.constant 0 : i32
    %c0_i32_1 = arith.constant 0 : i32
    return %c0_i32, %c0_i32_0 : i32, i32
  }
  func.func @transform_2(%arg0: i32) -> (i32, i32) {
    %c0_i32 = arith.constant 0 : i32
    %c0_i32_0 = arith.constant 0 : i32
    %c0_i32_1 = arith.constant 0 : i32
    return %c0_i32, %c0_i32_0 : i32, i32
  }
  func.func @transform_3(%arg0: i32) -> (i32, i32) {
    %c0_i32 = arith.constant 0 : i32
    %c0_i32_0 = arith.constant 0 : i32
    return %arg0, %c0_i32 : i32, i32
  }
}

</mosaic_0001>

<bundles_post_ra>
// kernel: multi_output_forward.1
= control target key start
LH: loop header
LB: loop body
LE: loop exit
PB: predicated region body
PF: predicated region fallthrough
CT: control target
= control target key end

     0   :  { %vm137_vm0 = vcmask 195648   ;;  %vm125_vm1 = vcmask 64512   ;;  %vm148_vm2 = vcmask 130048   ;;  %vm155_vm3 = vcmask 195584   ;;  %s339_s1 = inlined_call_operand.vmem [shape: f32[256,128], index: 1, kind: input, shape index: {}]   ;;  %s340_s0 = inlined_call_operand.vmem [shape: f32[8,256], index: 0, kind: input, shape index: {}]   ;;  %s341_s2 = inlined_call_operand.vmem [shape: f32[1,128], index: 2, kind: input, shape index: {}]   ;;  %s342_s3 = inlined_call_operand.vmem [shape: f32[8,128], index: 3, kind: output, shape index: {}]  }
   0x1   :  { %v47_v0 = vld [vmem:[%s339_s1 + $0xf8] sm:$0xff]  ;;  %v46_v2 = vld [vmem:[%s339_s1 + $0xf0] sm:$0xff]  ;;  %v45_v4 = vld [vmem:[%s339_s1 + $0xe8] sm:$0xff] }
   0x2   :  { %v31_v1 = vld [vmem:[%s339_s1 + $0x78] sm:$0xff]  ;;  %163 = vmatprep.subr.mxu0 %v47_v0  ;;  %v30_v3 = vld [vmem:[%s339_s1 + $0x70] sm:$0xff]  ;;  %v29_v5 = vld [vmem:[%s339_s1 + $0x68] sm:$0xff] }
   0x3   :  { %164 = vmatpush3.msra.mxu0 %v31_v1  ;;  %v44_v6 = vld [vmem:[%s339_s1 + $0xe0] sm:$0xff]  ;;  %v43_v8 = vld [vmem:[%s339_s1 + $0xd8] sm:$0xff]  ;;  %v42_v10 = vld [vmem:[%s339_s1 + $0xd0] sm:$0xff] }
   0x4   :  { %165 = vmatprep.subr.mxu0 %v46_v2  ;;  %v28_v7 = vld [vmem:[%s339_s1 + $0x60] sm:$0xff]  ;;  %v27_v9 = vld [vmem:[%s339_s1 + $0x58] sm:$0xff]  ;;  %v26_v11 = vld [vmem:[%s339_s1 + $0x50] sm:$0xff] }
   0x5   :  { %166 = vmatpush3.msra.mxu0 %v30_v3  ;;  %v41_v12 = vld [vmem:[%s339_s1 + $0xc8] sm:$0xff]  ;;  %v40_v15 = vld [vmem:[%s339_s1 + $0xc0] sm:$0xff]  ;;  %v39_v17 = vld [vmem:[%s339_s1 + $0xb8] sm:$0xff] }
   0x6   :  { %167 = vmatprep.subr.mxu0 %v45_v4  ;;  %v15_v13 = vld [vmem:[%s340_s0 + $0x8] sm:$0xff]  ;;  %v24_v16 = vld [vmem:[%s339_s1 + $0x40] sm:$0xff]  ;;  %v23_v18 = vld [vmem:[%s339_s1 + $0x38] sm:$0xff] }
   0x7   :  { %168 = vmatpush3.msra.mxu0 %v29_v5  ;;  %v25_v14 = vld [vmem:[%s339_s1 + $0x48] sm:$0xff]  ;;  %119 = vmatprep.mubr.f32.mxu0 %v15_v13  ;;  %v38_v19 = vld [vmem:[%s339_s1 + $0xb0] sm:$0xff]  ;;  %v36_v23 = vld [vmem:[%s339_s1 + $0xa0] sm:$0xff] }
   0x8   :  { %169 = vmatprep.subr.mxu0 %v44_v6  ;;  %v22_v20 = vld [vmem:[%s339_s1 + $0x30] sm:$0xff]  ;;  %v37_v21 = vld [vmem:[%s339_s1 + $0xa8] sm:$0xff]  ;;  %v20_v24 = vld [vmem:[%s339_s1 + $0x20] sm:$0xff] }
   0x9   :  { %170 = vmatpush3.msra.mxu0 %v28_v7  ;;  %v21_v22 = vld [vmem:[%s339_s1 + $0x28] sm:$0xff]  ;;  %v35_v25 = vld [vmem:[%s339_s1 + $0x98] sm:$0xff]  ;;  %v34_v27 = vld [vmem:[%s339_s1 + $0x90] sm:$0xff] }
   0xa   :  { %171 = vmatprep.subr.mxu0 %v43_v8  ;;  %v19_v26 = vld [vmem:[%s339_s1 + $0x18] sm:$0xff]  ;;  %v18_v28 = vld [vmem:[%s339_s1 + $0x10] sm:$0xff]  ;;  %v33_v29 = vld [vmem:[%s339_s1 + $0x88] sm:$0xff] }
   0xb   :  { %172 = vmatpush3.msra.mxu0 %v27_v9  ;;  %v17_v30 = vld [vmem:[%s339_s1 + $0x8] sm:$0xff]  ;;  %v32_v31 = vld [vmem:[%s339_s1 + $0x80] sm:$0xff] }
   0xc   :  { %173 = vmatprep.subr.mxu0 %v42_v10  ;;  %v16_v32 = vld [vmem:[%s339_s1] sm:$0xff] }
   0xd   :  { %174 = vmatpush3.msra.mxu0 %v26_v11  ;;  %v14_v33 = vld [vmem:[%s340_s0] sm:$0xff]  ;;  %s207_s0 = smov 120  }
   0xe   :  { %175 = vmatprep.subr.mxu0 %v41_v12  ;;  %v162_v35 = vld [vmem:[%s341_s2] ss:$0 sm:$0xff] }
   0xf   :  { %176 = vmatpush3.msra.mxu0 %v25_v14 }
  0x10   :  { %177 = vmatprep.subr.mxu0 %v40_v15 }
  0x11   :  { %178 = vmatpush3.msra.mxu0 %v24_v16 }
  0x12   :  { %179 = vmatprep.subr.mxu0 %v39_v17 }
  0x13   :  { %180 = vmatpush3.msra.mxu0 %v23_v18 }
  0x14   :  { %181 = vmatprep.subr.mxu0 %v38_v19 }
  0x15   :  { %182 = vmatpush3.msra.mxu0 %v22_v20 }
  0x16   :  { %183 = vmatprep.subr.mxu0 %v37_v21 }
  0x17   :  { %184 = vmatpush3.msra.mxu0 %v21_v22 }
  0x18   :  { %185 = vmatprep.subr.mxu0 %v36_v23 }
  0x19   :  { %186 = vmatpush3.msra.mxu0 %v20_v24 }
  0x1a   :  { %187 = vmatprep.subr.mxu0 %v35_v25 }
  0x1b   :  { %188 = vmatpush3.msra.mxu0 %v19_v26 }
  0x1c   :  { %189 = vmatprep.subr.mxu0 %v34_v27 }
  0x1d   :  { %190 = vmatpush3.msra.mxu0 %v18_v28 }
  0x1e   :  { %191 = vmatprep.subr.mxu0 %v33_v29 }
  0x1f   :  { %192 = vmatpush3.msra.mxu0 %v17_v30 }
  0x20   :  { %193 = vmatprep.subr.mxu0 %v32_v31 }
  0x21   :  { %194 = vmatpush3.msra.mxu0 %v16_v32 }
  0x22   :  { %120 = vmatmul.mubr.f32.vlgmr.msra.gmra.mxu0 %v14_v33 }
  0xe2   :  { %v195_v34 = vpop.f32.mrf.mxu0 }
  0xe4   :  { %v196_v36 = vpop.f32.mrf.mxu0 }
  0xe5   :  { %v197_v37 = vadd.f32 %v196_v36, %v195_v34 }
  0xe7   :  { %v122_v38 = vadd.f32 %v197_v37, %v162_v35 }
  0xe9   :  { %v138_v39 = vsel %vm137_vm0, %v122_v38, -inf  ;;  %v126_v40 = vsel %vm125_vm1, %v122_v38, -inf }
  0xea   :  { %139 = vmax.xlane.f32.xlu0 %v138_v39 }
  0xee   :  { %127 = vmax.xlane.f32.xlu0 %v126_v40 }
 0x173   :  { %v140_v41 = vpop.xlane.xlu0 %139 }
 0x174   :  { %v141_v42 = vsub.f32 %v122_v38, %v140_v41 }
 0x176   :  { %v142_v43 = vmul.f32 1.442695, %v141_v42 }
 0x177   :  { %v128_v45 = vpop.xlane.xlu0 %127 }
 0x178   :  { %199 = vpow2.f32 %v142_v43  ;;  %v129_v46 = vsub.f32 %v122_v38, %v128_v45 }
 0x17a   :  { %v130_v47 = vmul.f32 1.442695, %v129_v46 }
 0x17c   :  { %201 = vpow2.f32 %v130_v47 }
 0x185   :  { %v200_v44 = vpop.eup %199 }
 0x186   :  { %145 = vrot.lane.b32.xlu1 %v200_v44, %s207_s0 }
 0x189   :  { %v202_v48 = vpop.eup %201 }
 0x18a   :  { %v132_v49 = vsel %vm125_vm1, %v202_v48, 0.0 }
 0x1aa   :  { %133 = vadd.xlane.f32.xlu1 %v132_v49 }
 0x1f8   :  { %v146_v50 = vpop.permute.xlu1 %145 }
 0x1f9   :  { %v149_v51 = vsel %vm148_vm2, %v146_v50, 0.0 }
 0x1fa   :  { %150 = vadd.xlane.f32.xlu0 %v149_v51 }
 0x233   :  { %v134_v52 = vpop.xlane.xlu1 %133 }
 0x234   :  { %203 = vrcp.f32 %v134_v52 }
 0x241   :  { %v204_v54 = vpop.eup %203 }
 0x242   :  { %v136_v56 = vmul.f32 %v204_v54, %v202_v48 }
 0x283   :  { %v151_v53 = vpop.xlane.xlu0 %150 }
 0x284   :  { %205 = vrcp.f32 %v151_v53 }
 0x291   :  { %v206_v55 = vpop.eup %205 }
 0x292   :  { %v153_v57 = vmul.f32 %v206_v55, %v200_v44 }
 0x294   :  { %v154_v58 = vsel %vm125_vm1, %v136_v56, %v153_v57 }
 0x295   :  { %v156_v59 = vsel %vm155_vm3, %v154_v58, 0.0 }
 0x296   :  { %157 = vst [vmem:[%s342_s3] sm:$0xff] %v156_v59 }

</bundles_post_ra>
